<compile_context>
chip_gen: v7x
topology: tpu7x:2x2x1
jax: 0.10.0
libtpu: 0.0.40
codegen_flags: <defaults>
</compile_context>

<pallas_src>
import jax
import jax.numpy as jnp
import numpy as np
from jax.experimental import pallas as pl
from jax.experimental.pallas import tpu as pltpu


def _nconv_kernel(at_ref, x_ref, o_ref):
    # at_ref: (W, V) resident across the grid
    # x_ref:  (V, tile_n) streamed lane tile
    # o_ref:  (W, tile_n)
    o_ref[...] = jnp.dot(
        at_ref[...], x_ref[...],
        preferred_element_type=jnp.float32,
    ).astype(o_ref.dtype)


def _vmem_capacity_bytes():
    try:
        return int(pltpu.get_tpu_info().vmem_capacity_bytes)
    except Exception:
        # v7x (64 MiB per TensorCore) is the smallest supported generation.
        return 64 * 1024 * 1024


def _round_up(x, m):
    return ((x + m - 1) // m) * m


def nconv_node_major(x_vm, A, *, out_dtype=None):
    """Node-major nconv core.

    x_vm: (V, M) graph signal with the contraction (node) dim leading.
    A:    (V, W) adjacency / support matrix.
    Returns (W, M).
    """
    V, M = x_vm.shape
    V2, W = A.shape
    assert V == V2, "contraction dims must match"
    if out_dtype is None:
        out_dtype = jnp.result_type(x_vm.dtype, A.dtype)

    a_t = jnp.transpose(A)  # (W, V), tiny, fetched once and kept resident

    x_item = jnp.dtype(x_vm.dtype).itemsize
    o_item = jnp.dtype(out_dtype).itemsize
    a_item = jnp.dtype(A.dtype).itemsize
    vmem_cap = _vmem_capacity_bytes()

    if M <= 256:
        # Too small to split into legal (>=128-lane) tiles; one full-extent block.
        tile_n = M
    else:
        # Largest lane tile keeping double-buffered in+out tiles within ~40% of
        # this generation's VMEM, in multiples of 512 lanes.
        budget = int(vmem_cap * 0.4)
        per_lane = 2 * (V * x_item + W * o_item)      # 2 buffers x (in + out)
        auto = max(512, min((budget // per_lane) // 512 * 512, 32768))
        # Guarantee >=2 grid steps so both v7x TensorCores get work
        # (no-op on single-TC v5e/v6e).
        tile_n = min(auto, _round_up(-(-M // 2), 128))

    grid = (pl.cdiv(M, tile_n),)  # ragged last block: masked on writeback

    buf_bytes = 2 * tile_n * (V * x_item + W * o_item) + 2 * V * W * a_item
    vmem_limit = max(32 << 20, min(vmem_cap - (8 << 20), buf_bytes + (16 << 20)))

    cost = pl.CostEstimate(
        flops=2 * M * V * W,
        transcendentals=0,
        bytes_accessed=x_item * V * M + o_item * W * M + a_item * V * W,
    )

    return pl.pallas_call(
        _nconv_kernel,
        out_shape=jax.ShapeDtypeStruct((W, M), out_dtype),
        grid_spec=pltpu.PrefetchScalarGridSpec(
            num_scalar_prefetch=0,
            grid=grid,
            in_specs=[
                # A^T: same block every step -> fetched once, stays resident.
                pl.BlockSpec((W, V), lambda i: (0, 0)),
                # X: stream tile_n-wide lane tiles of the full contraction dim.
                pl.BlockSpec((V, tile_n), lambda i: (0, i)),
            ],
            out_specs=pl.BlockSpec((W, tile_n), lambda i: (0, i)),
        ),
        compiler_params=pltpu.CompilerParams(
            dimension_semantics=("parallel",),
            vmem_limit_bytes=int(vmem_limit),
        ),
        cost_estimate=cost,
    )(a_t, x_vm)


def nconv(x, A):
    """x: (N, C, V, L), A: (V, W)  ->  (N, C, W, L)

    out[n, c, w, l] = sum_v x[n, c, v, l] * A[v, w]
    """
    N, C, V, L = x.shape
    V2, W = A.shape
    assert V == V2, "contraction dims must match"
    M = N * C * L

    # TODO(synk): in the full Graph WaveNet these two relayout passes should be
    # hoisted to module boundaries -- keep activations in the node-major (V, M)
    # layout across the chained nconv / 1x1-conv calls and call
    # nconv_node_major directly; standalone torch-layout I/O forces them here.
    x_vm = jnp.transpose(x, (2, 0, 1, 3)).reshape(V, M)      # (V, M)
    out_vm = nconv_node_major(x_vm, A)                       # (W, M)
    return jnp.transpose(out_vm.reshape(W, N, C, L), (1, 2, 0, 3))


if __name__ == "__main__":
    key = jax.random.PRNGKey(0)

    def check(N, C, V, L, W, tag):
        kx, ka = jax.random.split(jax.random.fold_in(key, 1000 * N + L))
        x = jax.random.normal(kx, (N, C, V, L), dtype=jnp.float32)
        A = jax.random.normal(ka, (V, W), dtype=jnp.float32)
        out = jax.block_until_ready(nconv(x, A))
        ref = jnp.einsum('ncvl,vw->ncwl', x, A)
        assert out.shape == (N, C, W, L), tag
        np.testing.assert_allclose(np.asarray(out), np.asarray(ref),
                                   rtol=1e-5, atol=1e-5, err_msg=tag)

    # Small shapes consistent with the module: batch=2, channels=4,
    # num_nodes V=W=16, seq_len L=8  (M = 64, single full-extent block).
    check(2, 4, 16, 8, 16, "small")

    # Non-divisible M (= 320): exercises the masked ragged boundary block that
    # replaced the old jnp.pad + output-slice path.
    check(2, 4, 16, 40, 16, "ragged-M")

    print("KERNEL_OK")
</pallas_src>

<mosaic_0001>
module attributes {stable_mosaic.version = 11 : i64} {
  func.func @_nconv_kernel(%arg0: i32, %arg1: memref<16x16xf32, #tpu.memory_space<vmem>>, %arg2: memref<16x64xf32, #tpu.memory_space<vmem>>, %arg3: memref<16x64xf32, #tpu.memory_space<vmem>>) attributes {dimension_semantics = [#tpu.dimension_semantics<parallel>], iteration_bounds = array<i64: 1>, scalar_prefetch = 0 : i64, scratch_operands = 0 : i64, tpu.core_type = #tpu.core_type<tc>, window_params = [{pipeline_mode = #tpu.pipeline_mode<synchronous>, transform_indices = @transform_0, window_bounds = array<i64: 16, 16>}, {transform_indices = @transform_1, window_bounds = array<i64: 16, 64>}, {transform_indices = @transform_2, window_bounds = array<i64: 16, 64>}]} {
    %c0 = arith.constant 0 : index
    %c0_0 = arith.constant 0 : index
    %0 = vector.load %arg1[%c0, %c0_0] : memref<16x16xf32, #tpu.memory_space<vmem>>, vector<16x16xf32>
    %c0_1 = arith.constant 0 : index
    %c0_2 = arith.constant 0 : index
    %1 = vector.load %arg2[%c0_1, %c0_2] : memref<16x64xf32, #tpu.memory_space<vmem>>, vector<16x64xf32>
    %cst = arith.constant dense<0.000000e+00> : vector<16x64xf32>
    %2 = tpu.matmul %0, %1, %cst {dimension_numbers = #tpu.dot_dimension_numbers<[1], [0], [0], [1], [0, 0, 1, 1], [], []>} : vector<16x16xf32>, vector<16x64xf32>, vector<16x64xf32> -> vector<16x64xf32>
    %c0_3 = arith.constant 0 : index
    %c0_4 = arith.constant 0 : index
    %3 = vector.load %arg3[%c0_3, %c0_4] : memref<16x64xf32, #tpu.memory_space<vmem>>, vector<16x64xf32>
    tpu.vector_store %arg3[%c0_3, %c0_4], %2 {strides = array<i32>} : memref<16x64xf32, #tpu.memory_space<vmem>>, vector<16x64xf32>,
    return
  }
  func.func @transform_0(%arg0: i32) -> (i32, i32) {
    %c0_i32 = arith.constant 0 : i32
    %c0_i32_0 = arith.constant 0 : i32
    %c0_i32_1 = arith.constant 0 : i32
    return %c0_i32, %c0_i32_0 : i32, i32
  }
  func.func @transform_1(%arg0: i32) -> (i32, i32) {
    %c0_i32 = arith.constant 0 : i32
    %c0_i32_0 = arith.constant 0 : i32
    return %c0_i32, %arg0 : i32, i32
  }
  func.func @transform_2(%arg0: i32) -> (i32, i32) {
    %c0_i32 = arith.constant 0 : i32
    %c0_i32_0 = arith.constant 0 : i32
    return %c0_i32, %arg0 : i32, i32
  }
}

</mosaic_0001>

<bundles_post_ra>
// kernel: tpu_custom_call.1
= control target key start
LH: loop header
LB: loop body
LE: loop exit
PB: predicated region body
PF: predicated region fallthrough
CT: control target
= control target key end

     0   :  { %7 = vsyncpa [#allocation3], 0  ;;  %s306_s0 = inlined_call_operand.hbm [shape: f32[16,16], index: 0, kind: input, shape index: {}]   ;;  %s307_s1 = inlined_call_operand.hbm [shape: f32[16,64], index: 1, kind: input, shape index: {}]   ;;  %s308_s2 = inlined_call_operand.hbm [shape: f32[16,64], index: 2, kind: output, shape index: {}]  }
   0x1   :  { %8 = vsyncpa [#allocation6], 0 }
   0x2   :  { %9 = vsyncpa [#allocation4], 0  ;;  %s241_s9 = smov [#allocation2]   ;;  %s169_s13 = scalar_lea.hbm %s306_s0, 256 }
   0x3   :  { %s15_s10 = sshll.u32 %s241_s9, 4  ;;  %p170_p0 = scmp.ne.s32.totalorder %s306_s0, %s169_s13  ;;  %s16_s10 = int_to_ptr.vmem [resolvable:$true] %s15_s10 }
   0x4   :  { %p173_p1 = scmp.lt.u32.totalorder %s169_s13, %s306_s0 }
   0x6   :  { %p175_p2 = pnand %p173_p1, %p170_p0 }
   0x8   :  { %178 = shalt.err (!%p175_p2)
}
   0x9   :  { %s179_s18 = scalar_lea.vmem %s16_s10, 256  ;;  %p184_p4 = scmp.lt.s32.totalorder %s16_s10, %s16_s10 }
   0xa   :  { %p180_p3 = scmp.ne.s32.totalorder %s16_s10, %s179_s18  ;;  %p185_p5 = scmp.lt.s32.totalorder %s179_s18, %s179_s18 }
   0xc   :  { %p186_p6 = por %p185_p5, %p184_p4 }
   0xe   :  { %p187_p7 = pnand %p186_p6, %p180_p3 }
  0x10   :  { %190 = shalt.err (!%p187_p7)
}
  0x11   :  { %s242_s19 = smov 128   ;;  %s243_s20 = smov 8  }
  0x12   :  { %21 = dma.hbm_to_vmem [thread:$0]  %s306_s0, 256, %s16_s10, [#allocation3], %s242_s19, %s242_s19, %s243_s20  }
  0x13   :  { %s244_s23 = smov [#allocation5]   ;;  %s191_s27 = scalar_lea.hbm %s307_s1, 256 }
  0x14   :  { %s27_s24 = sshll.u32 %s244_s23, 4  ;;  %p192_p8 = scmp.ne.s32.totalorder %s307_s1, %s191_s27  ;;  %s28_s24 = int_to_ptr.vmem [resolvable:$true] %s27_s24 }
  0x15   :  { %p195_p9 = scmp.lt.u32.totalorder %s191_s27, %s307_s1 }
  0x17   :  { %p197_p10 = pnand %p195_p9, %p192_p8 }
  0x19   :  { %200 = shalt.err (!%p197_p10)
}
  0x1a   :  { %s201_s4 = scalar_lea.vmem %s28_s24, 256  ;;  %p206_p12 = scmp.lt.s32.totalorder %s28_s24, %s28_s24 }
  0x1b   :  { %p202_p11 = scmp.ne.s32.totalorder %s28_s24, %s201_s4  ;;  %p207_p13 = scmp.lt.s32.totalorder %s201_s4, %s201_s4 }
  0x1d   :  { %p208_p0 = por %p207_p13, %p206_p12 }
  0x1f   :  { %p209_p1 = pnand %p208_p0, %p202_p11 }
  0x21   :  { %212 = shalt.err (!%p209_p1)
}
  0x22   :  { %33 = dma.hbm_to_vmem [thread:$0]  %s307_s1, 256, %s28_s24, [#allocation6], %s242_s19, %s242_s19, %s243_s20  }
  0x23   :  { %235 = dma.done.wait [#allocation3], 256  }
  0x24   :  { %236 = vsyncadd [#allocation3], 4294967040 }
  0x25   :  { %237 = dma.done.wait [#allocation6], 256  }
  0x26   :  { %238 = vsyncadd [#allocation6], 4294967040  ;;  %vm44_vm0 = vcmask 130048   ;;  %v42_v0 = vld [vmem:[#allocation5] sm:$0xff]  ;;  %v43_v1 = vld [vmem:[#allocation5 + $0x8] sm:$0xff]  ;;  %s245_s6 = smov [#allocation7]  }
  0x27   :  { %v40_v2 = vld [vmem:[#allocation2] sm:$0xff]  ;;  %v160_v3 = vpack.c.bf16 %v43_v1, %v42_v0  ;;  %v41_v4 = vld [vmem:[#allocation2 + $0x8] sm:$0xff]  ;;  %s134_s7 = sshll.u32 %s245_s6, 4  ;;  %vm126_vm1 = vcmask 523264   ;;  %s135_s7 = int_to_ptr.vmem [resolvable:$true] %s134_s7 }
  0x28   :  { %157 = vmatprep.mubr.msk.f32.mxu0 %vm44_vm0, %v40_v2  ;;  %s213_s1 = scalar_lea.vmem %s135_s7, 256  ;;  %p218_p3 = scmp.lt.s32.totalorder %s135_s7, %s135_s7 }
  0x29   :  { %161 = vmatprep.subr.bf16.mxu0 %v160_v3  ;;  %p214_p2 = scmp.ne.s32.totalorder %s135_s7, %s213_s1  ;;  %p219_p4 = scmp.lt.s32.totalorder %s213_s1, %s213_s1 }
  0x2a   :  { %163 = vmatpush3.bf16.msra.mxu0 %v160_v3 }
  0x2b   :  { %p220_p5 = por %p219_p4, %p218_p3 }
  0x2d   :  { %158 = vmatmul.mubr.msk.f32.vlgmr.msra.gmra.mrb[0].mxu0 %vm44_vm0, %v41_v4  ;;  %p221_p6 = pnand %p220_p5, %p214_p2 }
 0x100   :  { %v159_v5 = vpop.f32.mrb[0].mxu0 }
 0x101   :  { %128 = vst.msk [vmem:[#allocation7 + $0x8] sm:$0xff] %vm126_vm1, %v159_v5  ;;  %v117_v6 = vpop.f32.mrb[1].mxu0 }
 0x102   :  { %127 = vst.msk [vmem:[#allocation7] sm:$0xff] %vm126_vm1, %v117_v6 }
 0x103   :  { %224 = shalt.err (!%p221_p6)
}
 0x104   :  { %s225_s10 = scalar_lea.hbm %s308_s2, 256 }
 0x105   :  { %p226_p7 = scmp.ne.s32.totalorder %s308_s2, %s225_s10  ;;  %p229_p8 = scmp.lt.u32.totalorder %s225_s10, %s308_s2 }
 0x107   :  { %p231_p9 = pnand %p229_p8, %p226_p7 }
 0x109   :  { %234 = shalt.err (!%p231_p9)
}
 0x10a   :  { %140 = dma.vmem_to_hbm [thread:$0]  %s135_s7, 256, %s308_s2, [#allocation4], %s242_s19, %s242_s19, %s243_s20  }
 0x10b   :  { %239 = dma.done.wait [#allocation4], 256  }
 0x10c   :  { %240 = vsyncadd [#allocation4], 4294967040 }
 0x10d   :  { %144 = vsyncpa [#allocation3], 1 }
 0x10e   :  { %145 = vsyncpa [#allocation6], 1 }
 0x10f   :  { %146 = vsyncpa [#allocation4], 1 }

</bundles_post_ra>
